<compile_context>
chip_gen: v7x
topology: tpu7x:2x2x1
jax: 0.10.0
libtpu: 0.0.40
codegen_flags: <defaults>
</compile_context>

<pallas_src>
import functools

import jax
import jax.numpy as jnp
from jax.experimental import pallas as pl
from jax.experimental.pallas import tpu as pltpu


def _round_up(x, m):
    return ((x + m - 1) // m) * m


def _pad_mask_kernel(idx_ref, emb_ref, out_ref, *, pad_id):
    # idx_ref : (TM, 1) int32 VMEM tile
    # emb_ref : (TM, D) float  VMEM tile
    # mask is (TM, 1): cheap lane-broadcast of a size-1 lane over D.
    mask = (idx_ref[...] != pad_id).astype(emb_ref.dtype)
    out_ref[...] = emb_ref[...] * mask


def pad_mask_apply(masked_embeddings, sequence_index, pad_id,
                   *, block_rows=None, donate=False):
    """Pallas equivalent of Pad_Mask.forward(masked_embeddings, sequence_index, ...)."""
    B, S, D = masked_embeddings.shape
    rows = B * S
    dtype = masked_embeddings.dtype
    itemsize = jnp.dtype(dtype).itemsize

    emb = masked_embeddings.reshape(rows, D)
    idx = sequence_index.reshape(rows, 1).astype(jnp.int32)

    # Row tile: aim for ~1-2 MiB per embedding block, multiple of 8 sublanes,
    # capped at the (8-rounded) number of rows so tiny inputs stay one block.
    if block_rows is None:
        target_bytes = 2 * 1024 * 1024
        tm = max(8, min(2048, target_bytes // max(D * itemsize, 1)))
        block_rows = max(8, (tm // 8) * 8)
    block_rows = min(block_rows, _round_up(rows, 8))

    padded_rows = _round_up(rows, block_rows)
    if padded_rows != rows:
        emb = jnp.pad(emb, ((0, padded_rows - rows), (0, 0)))
        idx = jnp.pad(idx, ((0, padded_rows - rows), (0, 0)))

    grid = (padded_rows // block_rows,)

    kernel = functools.partial(_pad_mask_kernel, pad_id=int(pad_id))

    cost = pl.CostEstimate(
        flops=padded_rows * D,
        transcendentals=0,
        bytes_accessed=2 * padded_rows * D * itemsize + padded_rows * 4,
    )

    out = pl.pallas_call(
        kernel,
        out_shape=jax.ShapeDtypeStruct((padded_rows, D), dtype),
        grid=grid,
        in_specs=[
            pl.BlockSpec((block_rows, 1), lambda i: (i, 0)),   # sequence index
            pl.BlockSpec((block_rows, D), lambda i: (i, 0)),   # embeddings
        ],
        out_specs=pl.BlockSpec((block_rows, D), lambda i: (i, 0)),
        compiler_params=pltpu.CompilerParams(
            dimension_semantics=("parallel",)),
        cost_estimate=cost,
        input_output_aliases=({1: 0} if donate else {}),
    )(idx, emb)

    return out[:rows].reshape(B, S, D)


class PadMask:
    """Mirror of the PyTorch module: no learned params, just pad ids + d_model."""

    def __init__(self, pad_ids, d_model):
        # pad_ids: dict like {'src': <int>, 'target': <int>}  (static, in-script)
        self.pad = dict(pad_ids)
        self.d_model = d_model

    def __call__(self, masked_embeddings, sequence_index, src_or_target: str):
        return pad_mask_apply(masked_embeddings, sequence_index,
                              self.pad[src_or_target])


if __name__ == "__main__":
    # Small but lane-dense d_model (multiple of 128) so the output block lowers
    # to unmasked vector stores.
    B, S, D = 2, 8, 128
    key = jax.random.PRNGKey(0)
    k_emb, k_idx = jax.random.split(key)

    # Deterministic "vocabulary" convention: src <pad> = 0, target <pad> = 1.
    pad_ids = {"src": 0, "target": 1}
    model = PadMask(pad_ids, d_model=D)

    masked_embeddings = jax.random.normal(k_emb, (B, S, D), dtype=jnp.float32)
    # Token ids in [0, 10); some of them will equal the pad id 0.
    sequence_index = jax.random.randint(k_idx, (B, S), 0, 10, dtype=jnp.int32)
    # Force a few explicit pad positions (like trailing padding of a sequence).
    sequence_index = sequence_index.at[:, -2:].set(pad_ids["src"])

    out = model(masked_embeddings, sequence_index, "src")
    out = jax.block_until_ready(out)

    # Pure-JAX reference for correctness.
    ref = masked_embeddings * (sequence_index != pad_ids["src"]).astype(
        jnp.float32)[:, :, None]
    assert out.shape == (B, S, D)
    assert out.dtype == jnp.float32
    assert jnp.allclose(out, ref, atol=0, rtol=0)

    print("KERNEL_OK")
</pallas_src>

<mosaic_0001>
module attributes {stable_mosaic.version = 11 : i64} {
  func.func @_pad_mask_kernel(%arg0: i32, %arg1: memref<16x1xi32, #tpu.memory_space<vmem>>, %arg2: memref<16x128xf32, #tpu.memory_space<vmem>>, %arg3: memref<16x128xf32, #tpu.memory_space<vmem>>) attributes {dimension_semantics = [#tpu.dimension_semantics<parallel>], iteration_bounds = array<i64: 1>, scalar_prefetch = 0 : i64, scratch_operands = 0 : i64, tpu.core_type = #tpu.core_type<tc>, window_params = [{transform_indices = @transform_0, window_bounds = array<i64: 16, 1>}, {transform_indices = @transform_1, window_bounds = array<i64: 16, 128>}, {transform_indices = @transform_2, window_bounds = array<i64: 16, 128>}]} {
    %c0 = arith.constant 0 : index
    %c0_0 = arith.constant 0 : index
    %0 = vector.load %arg1[%c0, %c0_0] : memref<16x1xi32, #tpu.memory_space<vmem>>, vector<16x1xi32>
    %c0_i32 = arith.constant 0 : i32
    %1 = vector.broadcast %c0_i32 : i32 to vector<16x1xi32>
    %2 = arith.cmpi ne, %0, %1 : vector<16x1xi32>
    %3 = arith.extui %2 : vector<16x1xi1> to vector<16x1xi32>
    %4 = arith.sitofp %3 : vector<16x1xi32> to vector<16x1xf32>
    %c0_1 = arith.constant 0 : index
    %c0_2 = arith.constant 0 : index
    %5 = vector.load %arg2[%c0_1, %c0_2] : memref<16x128xf32, #tpu.memory_space<vmem>>, vector<16x128xf32>
    %6 = vector.broadcast %4 : vector<16x1xf32> to vector<16x128xf32>
    %7 = arith.mulf %5, %6 : vector<16x128xf32>
    %c0_3 = arith.constant 0 : index
    %c0_4 = arith.constant 0 : index
    %8 = vector.load %arg3[%c0_3, %c0_4] : memref<16x128xf32, #tpu.memory_space<vmem>>, vector<16x128xf32>
    tpu.vector_store %arg3[%c0_3, %c0_4], %7 {strides = array<i32>} : memref<16x128xf32, #tpu.memory_space<vmem>>, vector<16x128xf32>,
    return
  }
  func.func @transform_0(%arg0: i32) -> (i32, i32) {
    %c0_i32 = arith.constant 0 : i32
    %c0_i32_0 = arith.constant 0 : i32
    return %arg0, %c0_i32 : i32, i32
  }
  func.func @transform_1(%arg0: i32) -> (i32, i32) {
    %c0_i32 = arith.constant 0 : i32
    %c0_i32_0 = arith.constant 0 : i32
    return %arg0, %c0_i32 : i32, i32
  }
  func.func @transform_2(%arg0: i32) -> (i32, i32) {
    %c0_i32 = arith.constant 0 : i32
    %c0_i32_0 = arith.constant 0 : i32
    return %arg0, %c0_i32 : i32, i32
  }
}

</mosaic_0001>

<bundles_post_ra>
// kernel: tpu_custom_call.1
= control target key start
LH: loop header
LB: loop body
LE: loop exit
PB: predicated region body
PF: predicated region fallthrough
CT: control target
= control target key end

     0   :  { %v89_v2 = vmov 0   ;;  %s133_s0 = inlined_call_operand.vmem [shape: s32[16,1], index: 0, kind: input, shape index: {}]   ;;  %s134_s1 = inlined_call_operand.vmem [shape: f32[16,128], index: 1, kind: input, shape index: {}]   ;;  %s135_s2 = inlined_call_operand.hbm [shape: f32[16,128], index: 2, kind: output, shape index: {}]  }
   0x1   :  { %v12_v0 = vld [vmem:[%s133_s0] sm:$0xff]  ;;  %v13_v1 = vld [vmem:[%s133_s0 + $0x8] sm:$0xff]  ;;  %59 = vset.pattern.permute.xlu0 %v89_v2 }
   0x2   :  { %vm14_vm0 = vcmp.ne.s32.totalorder %v12_v0, 0  ;;  %vm15_vm1 = vcmp.ne.s32.totalorder %v13_v1, 0 }
   0x3   :  { %7 = vsyncpa [#allocation3], 0  ;;  %v90_v3 = vmov 0.0   ;;  %s91_s13 = smov [#allocation2]   ;;  %v20_v7 = vld [vmem:[%s134_s1] sm:$0xff]  ;;  %v21_v8 = vld [vmem:[%s134_s1 + $0x8] sm:$0xff] }
   0x4   :  { %v52_v4 = vsel %vm14_vm0, 1.0, %v90_v3  ;;  %v53_v5 = vsel %vm15_vm1, 1.0, %v90_v3  ;;  %s41_s14 = sshll.u32 %s91_s13, 4  ;;  %s42_s14 = int_to_ptr.vmem [resolvable:$true] %s41_s14 }
   0x5   :  { %v60_v6 = vpack.i.bf16 %v53_v5, %v52_v4  ;;  %s65_s0 = scalar_lea.vmem %s42_s14, 256  ;;  %p70_p1 = scmp.lt.s32.totalorder %s42_s14, %s42_s14 }
   0x6   :  { %p66_p0 = scmp.ne.s32.totalorder %s42_s14, %s65_s0  ;;  %p71_p2 = scmp.lt.s32.totalorder %s65_s0, %s65_s0 }
   0x7   :  { %61 = vperm.xlu0 %59, %v60_v6  }
   0x8   :  { %p72_p3 = por %p71_p2, %p70_p1 }
   0xa   :  { %p73_p4 = pnand %p72_p3, %p66_p0 }
  0x86   :  { %v62_v9 = vpop.permute.xlu0 %61 }
  0x87   :  { %v64_v10 = vunpack.i.h.bf16 %v62_v9  ;;  %v63_v11 = vunpack.i.l.bf16 %v62_v9 }
  0x89   :  { %v33_v12 = vmul.f32 %v64_v10, %v21_v8  ;;  %v32_v13 = vmul.f32 %v63_v11, %v20_v7 }
  0x8b   :  { %35 = vst [vmem:[#allocation2 + $0x8] sm:$0xff] %v33_v12  ;;  %34 = vst [vmem:[#allocation2] sm:$0xff] %v32_v13 }
  0x8c   :  { %76 = shalt.err (!%p73_p4)
}
  0x8d   :  { %s77_s21 = scalar_lea.hbm %s135_s2, 256 }
  0x8e   :  { %p78_p5 = scmp.ne.s32.totalorder %s135_s2, %s77_s21  ;;  %p81_p6 = scmp.lt.u32.totalorder %s77_s21, %s135_s2 }
  0x90   :  { %p83_p7 = pnand %p81_p6, %p78_p5 }
  0x92   :  { %86 = shalt.err (!%p83_p7)
}
  0x93   :  { %s92_s25 = smov 128   ;;  %s93_s26 = smov 8  }
  0x94   :  { %47 = dma.vmem_to_hbm [thread:$0]  %s42_s14, 256, %s135_s2, [#allocation3], %s92_s25, %s92_s25, %s93_s26  }
  0x95   :  { %87 = dma.done.wait [#allocation3], 256  }
  0x96   :  { %88 = vsyncadd [#allocation3], 4294967040 }
  0x97   :  { %51 = vsyncpa [#allocation3], 1 }

</bundles_post_ra>
